<compile_context>
chip_gen: v7x
topology: tpu7x:2x2x1
jax: 0.10.0
libtpu: 0.0.40
codegen_flags: <defaults>
</compile_context>

<pallas_src>
import jax
import jax.numpy as jnp
from jax.experimental import pallas as pl
from jax.experimental.pallas import tpu as pltpu


def cnn1d_kernel(x_ref, w1_ref, b1_ref, w2_ref, b2_ref, wfc_ref, bfc_ref,
                 out_ref):
    TB, Cin, L = x_ref.shape                 # x tile in native NCW layout
    C1 = w1_ref.shape[2]
    C2 = w2_ref.shape[2]
    M = TB * L

    # ---- channels-last + in-kernel zero padding, all in f32 (sublane-granular
    #      rows -> the shifted tap views below are cheap rotates, no bf16 repack).
    xcl = jnp.transpose(x_ref[...], (0, 2, 1))                  # (TB, L, Cin)
    zx = jnp.zeros((TB, 1, Cin), jnp.float32)
    xpad = jnp.concatenate([zx, xcl, zx], axis=1)               # (TB, L+2, Cin)

    # ---- conv1 (k=3, p=1): three accumulated per-tap dots, f32 accumulation.
    acc1 = jnp.zeros((M, C1), jnp.float32)
    for k in range(3):                                          # static unroll
        tap = xpad[:, k:k + L, :].reshape(M, Cin).astype(jnp.bfloat16)
        acc1 = acc1 + jnp.dot(tap, w1_ref[k],
                              preferred_element_type=jnp.float32)
    h1 = jnp.maximum(acc1 + b1_ref[...], 0.0)                   # (M, C1) f32

    # ---- conv2 (k=3, p=1): same scheme; bf16 only right before the dot.
    zh = jnp.zeros((TB, 1, C1), jnp.float32)
    h1p = jnp.concatenate([zh, h1.reshape(TB, L, C1), zh], axis=1)  # (TB, L+2, C1)
    acc2 = jnp.zeros((M, C2), jnp.float32)
    for k in range(3):
        tap = h1p[:, k:k + L, :].reshape(M, C1).astype(jnp.bfloat16)
        acc2 = acc2 + jnp.dot(tap, w2_ref[k],
                              preferred_element_type=jnp.float32)
    h2 = jnp.maximum(acc2 + b2_ref[...], 0.0)                   # (M, C2) f32

    # ---- fused global-avg-pool + fc: contract C2 first (lane reduce), then
    #      average groups of L rows (AdaptiveAvgPool1d(1) == mean over L).
    s = jnp.sum(h2 * wfc_ref[...], axis=-1, keepdims=True)      # (M, 1) f32
    pooled = jnp.mean(s.reshape(TB, L), axis=-1, keepdims=True)  # (TB, 1)
    out_ref[...] = pooled + bfc_ref[0]                          # scalar bias (SMEM)


def prepare_params(params):
    """One-time weight re-layout for the kernel (hoisted out of the hot path)."""
    w1, b1, w2, b2, wfc, bfc = params
    c1, cin, k = w1.shape
    c2 = w2.shape[0]
    # Per-tap weight slices: w_taps[k] = w[:, :, k].T -> (Cin, Cout), bf16.
    w1_taps = jnp.transpose(w1, (2, 1, 0)).astype(jnp.bfloat16)   # (3, Cin, C1)
    w2_taps = jnp.transpose(w2, (2, 1, 0)).astype(jnp.bfloat16)   # (3, C1, C2)
    return (w1_taps,
            b1.reshape(1, c1).astype(jnp.float32),
            w2_taps,
            b2.reshape(1, c2).astype(jnp.float32),
            wfc.reshape(1, c2).astype(jnp.float32),   # row vector for lane reduce
            bfc.reshape(1).astype(jnp.float32))       # scalar -> SMEM


def _pick_batch_tile(B, L, batch_tile):
    """Target ~256 M-rows per grid step.  TB must be a multiple of 8 (sublane
    granularity of the (TB, 1) output block) that divides B, else fall back to
    a single full-batch tile (always legal: block == full array)."""
    if batch_tile is None:
        batch_tile = max(1, 256 // max(L, 1))
    if batch_tile >= B:
        return B
    tb = (batch_tile // 8) * 8
    while tb >= 8 and B % tb:
        tb -= 8
    return tb if tb >= 8 else B


def cnn_1d_forward(x, prepared, *, batch_tile=None, vmem_limit_bytes=None):
    """x: (B, C, F, T) float32 with T == 1 (matches the PyTorch module)."""
    B, C, F, T = x.shape
    xs = jnp.squeeze(x, -1)                        # (B, C, F) — free reshape
    w1_taps, b1, w2_taps, b2, wfc, bfc = prepared
    C1 = w1_taps.shape[2]
    C2 = w2_taps.shape[2]
    L = F

    TB = _pick_batch_tile(B, L, batch_tile)
    grid = (B // TB,)

    flops = 2 * B * L * (3 * C * C1 + 3 * C1 * C2 + C2)
    bytes_accessed = (xs.size * 4 + w1_taps.size * 2 + w2_taps.size * 2
                      + (b1.size + b2.size + wfc.size + bfc.size + B) * 4)

    out = pl.pallas_call(
        cnn1d_kernel,
        out_shape=jax.ShapeDtypeStruct((B, 1), jnp.float32),
        grid_spec=pltpu.PrefetchScalarGridSpec(
            num_scalar_prefetch=0,
            grid=grid,
            in_specs=[
                # Batch-tiled input; weights/biases stay VMEM-resident
                # (constant index maps), fc bias as an SMEM scalar.
                pl.BlockSpec((TB, C, L), lambda i: (i, 0, 0)),
                pl.BlockSpec((3, C, C1), lambda i: (0, 0, 0)),
                pl.BlockSpec((1, C1), lambda i: (0, 0)),
                pl.BlockSpec((3, C1, C2), lambda i: (0, 0, 0)),
                pl.BlockSpec((1, C2), lambda i: (0, 0)),
                pl.BlockSpec((1, C2), lambda i: (0, 0)),
                pl.BlockSpec(memory_space=pltpu.MemorySpace.SMEM),
            ],
            out_specs=pl.BlockSpec((TB, 1), lambda i: (i, 0)),
        ),
        compiler_params=pltpu.CompilerParams(
            # Batch tiles are independent -> shard across TCs (2 TCs on v7x).
            dimension_semantics=("parallel",),
            vmem_limit_bytes=vmem_limit_bytes,
        ),
        cost_estimate=pl.CostEstimate(flops=flops, transcendentals=0,
                                      bytes_accessed=bytes_accessed),
    )(xs, w1_taps, b1, w2_taps, b2, wfc, bfc)
    return out                                       # (B, 1)


def init_params(key, num_channels=8, conv1_out=32, hidden_dim=64, ksize=3):
    """Deterministic init mimicking PyTorch default (uniform +/- 1/sqrt(fan_in))."""
    ks = jax.random.split(key, 6)

    def unif(k, shape, fan_in):
        bound = 1.0 / jnp.sqrt(fan_in)
        return jax.random.uniform(k, shape, jnp.float32, -bound, bound)

    w1 = unif(ks[0], (conv1_out, num_channels, ksize), num_channels * ksize)
    b1 = unif(ks[1], (conv1_out,), num_channels * ksize)
    w2 = unif(ks[2], (hidden_dim, conv1_out, ksize), conv1_out * ksize)
    b2 = unif(ks[3], (hidden_dim,), conv1_out * ksize)
    wfc = unif(ks[4], (1, hidden_dim), hidden_dim)
    bfc = unif(ks[5], (1,), hidden_dim)
    return (w1, b1, w2, b2, wfc, bfc)


def reference_forward(x, params):
    """Pure-JAX f32 reference mirroring the PyTorch forward (for verification)."""
    w1, b1, w2, b2, wfc, bfc = params
    xs = x[..., 0]                                          # (B, C, L)

    def conv1d(inp, w, b):
        L = inp.shape[2]
        ip = jnp.pad(inp, ((0, 0), (0, 0), (1, 1)))
        out = sum(jnp.einsum('bcl,dc->bdl', ip[:, :, k:k + L], w[:, :, k])
                  for k in range(3))
        return out + b[None, :, None]

    h1 = jax.nn.relu(conv1d(xs, w1, b1))
    h2 = jax.nn.relu(conv1d(h1, w2, b2))
    pooled = h2.mean(axis=2)                                # (B, hidden)
    return pooled @ wfc.T + bfc[None, :]                    # (B, 1)


if __name__ == "__main__":
    key = jax.random.PRNGKey(0)
    kx, kp = jax.random.split(key)

    B, C, F, T = 2, 8, 16, 1                  # batch, channels, freq_bins, time
    x = jax.random.normal(kx, (B, C, F, T), jnp.float32)
    params = init_params(kp, num_channels=C, conv1_out=32, hidden_dim=64)
    prepared = prepare_params(params)         # one-time weight re-layout

    out = cnn_1d_forward(x, prepared)
    out = jax.block_until_ready(out)

    ref = jax.block_until_ready(reference_forward(x, params))
    assert out.shape == (B, 1), out.shape
    # bf16 matmul operands with f32 accumulation -> looser tolerance vs f32 ref.
    assert jnp.allclose(out, ref, atol=2e-2, rtol=2e-2), (out, ref)

    print("KERNEL_OK")
</pallas_src>

<mosaic_0001>
module attributes {stable_mosaic.version = 11 : i64} {
  func.func @cnn1d_kernel(%arg0: i32, %arg1: memref<2x8x16xf32, #tpu.memory_space<vmem>>, %arg2: memref<3x8x32xbf16, #tpu.memory_space<vmem>>, %arg3: memref<1x32xf32, #tpu.memory_space<vmem>>, %arg4: memref<3x32x64xbf16, #tpu.memory_space<vmem>>, %arg5: memref<1x64xf32, #tpu.memory_space<vmem>>, %arg6: memref<1x64xf32, #tpu.memory_space<vmem>>, %arg7: memref<1xf32, #tpu.memory_space<smem>>, %arg8: memref<2x1xf32, #tpu.memory_space<vmem>>) attributes {dimension_semantics = [#tpu.dimension_semantics<parallel>], iteration_bounds = array<i64: 1>, scalar_prefetch = 0 : i64, scratch_operands = 0 : i64, tpu.core_type = #tpu.core_type<tc>, window_params = [{transform_indices = @transform_0, window_bounds = array<i64: 2, 8, 16>}, {pipeline_mode = #tpu.pipeline_mode<synchronous>, transform_indices = @transform_1, window_bounds = array<i64: 3, 8, 32>}, {pipeline_mode = #tpu.pipeline_mode<synchronous>, transform_indices = @transform_2, window_bounds = array<i64: 1, 32>}, {pipeline_mode = #tpu.pipeline_mode<synchronous>, transform_indices = @transform_3, window_bounds = array<i64: 3, 32, 64>}, {pipeline_mode = #tpu.pipeline_mode<synchronous>, transform_indices = @transform_4, window_bounds = array<i64: 1, 64>}, {pipeline_mode = #tpu.pipeline_mode<synchronous>, transform_indices = @transform_5, window_bounds = array<i64: 1, 64>}, {transform_indices = @transform_6, window_bounds = array<i64: 1>}, {transform_indices = @transform_7, window_bounds = array<i64: 2, 1>}]} {
    %c0 = arith.constant 0 : index
    %c0_0 = arith.constant 0 : index
    %c0_1 = arith.constant 0 : index
    %0 = vector.load %arg1[%c0, %c0_0, %c0_1] : memref<2x8x16xf32, #tpu.memory_space<vmem>>, vector<2x8x16xf32>
    %1 = tpu.transpose %0, [0, 2, 1] : vector<2x8x16xf32> -> vector<2x16x8xf32>
    %cst = arith.constant 0.000000e+00 : f32
    %2 = vector.broadcast %cst : f32 to vector<2x1x8xf32>
    %3 = tpu.concatenate %2, %1, %2 in 1 : vector<2x1x8xf32>, vector<2x16x8xf32>, vector<2x1x8xf32> -> vector<2x18x8xf32>
    %cst_2 = arith.constant 0.000000e+00 : f32
    %4 = vector.broadcast %cst_2 : f32 to vector<32x32xf32>
    %5 = vector.extract_strided_slice %3 {offsets = [0, 0, 0], sizes = [2, 16, 8], strides = [1, 1, 1]} : vector<2x18x8xf32> to vector<2x16x8xf32>
    %6 = vector.shape_cast %5 : vector<2x16x8xf32> to vector<32x8xf32>
    %7 = arith.truncf %6 : vector<32x8xf32> to vector<32x8xbf16>
    %c0_3 = arith.constant 0 : index
    %c0_4 = arith.constant 0 : index
    %c0_5 = arith.constant 0 : index
    %8 = vector.load %arg2[%c0_3, %c0_4, %c0_5] : memref<3x8x32xbf16, #tpu.memory_space<vmem>>, vector<1x8x32xbf16>
    %9 = vector.shape_cast %8 : vector<1x8x32xbf16> to vector<8x32xbf16>
    %cst_6 = arith.constant dense<0.000000e+00> : vector<32x32xf32>
    %10 = tpu.matmul %7, %9, %cst_6 {dimension_numbers = #tpu.dot_dimension_numbers<[1], [0], [0], [1], [0, 0, 1, 1], [], []>} : vector<32x8xbf16>, vector<8x32xbf16>, vector<32x32xf32> -> vector<32x32xf32>
    %11 = arith.addf %4, %10 : vector<32x32xf32>
    %12 = vector.extract_strided_slice %3 {offsets = [0, 1, 0], sizes = [2, 16, 8], strides = [1, 1, 1]} : vector<2x18x8xf32> to vector<2x16x8xf32>
    %13 = vector.shape_cast %12 : vector<2x16x8xf32> to vector<32x8xf32>
    %14 = arith.truncf %13 : vector<32x8xf32> to vector<32x8xbf16>
    %c1 = arith.constant 1 : index
    %c0_7 = arith.constant 0 : index
    %c0_8 = arith.constant 0 : index
    %15 = vector.load %arg2[%c1, %c0_7, %c0_8] : memref<3x8x32xbf16, #tpu.memory_space<vmem>>, vector<1x8x32xbf16>
    %16 = vector.shape_cast %15 : vector<1x8x32xbf16> to vector<8x32xbf16>
    %cst_9 = arith.constant dense<0.000000e+00> : vector<32x32xf32>
    %17 = tpu.matmul %14, %16, %cst_9 {dimension_numbers = #tpu.dot_dimension_numbers<[1], [0], [0], [1], [0, 0, 1, 1], [], []>} : vector<32x8xbf16>, vector<8x32xbf16>, vector<32x32xf32> -> vector<32x32xf32>
    %18 = arith.addf %11, %17 : vector<32x32xf32>
    %19 = vector.extract_strided_slice %3 {offsets = [0, 2, 0], sizes = [2, 16, 8], strides = [1, 1, 1]} : vector<2x18x8xf32> to vector<2x16x8xf32>
    %20 = vector.shape_cast %19 : vector<2x16x8xf32> to vector<32x8xf32>
    %21 = arith.truncf %20 : vector<32x8xf32> to vector<32x8xbf16>
    %c2 = arith.constant 2 : index
    %c0_10 = arith.constant 0 : index
    %c0_11 = arith.constant 0 : index
    %22 = vector.load %arg2[%c2, %c0_10, %c0_11] : memref<3x8x32xbf16, #tpu.memory_space<vmem>>, vector<1x8x32xbf16>
    %23 = vector.shape_cast %22 : vector<1x8x32xbf16> to vector<8x32xbf16>
    %cst_12 = arith.constant dense<0.000000e+00> : vector<32x32xf32>
    %24 = tpu.matmul %21, %23, %cst_12 {dimension_numbers = #tpu.dot_dimension_numbers<[1], [0], [0], [1], [0, 0, 1, 1], [], []>} : vector<32x8xbf16>, vector<8x32xbf16>, vector<32x32xf32> -> vector<32x32xf32>
    %25 = arith.addf %18, %24 : vector<32x32xf32>
    %c0_13 = arith.constant 0 : index
    %c0_14 = arith.constant 0 : index
    %26 = vector.load %arg3[%c0_13, %c0_14] : memref<1x32xf32, #tpu.memory_space<vmem>>, vector<1x32xf32>
    %27 = vector.broadcast %26 : vector<1x32xf32> to vector<32x32xf32>
    %28 = arith.addf %25, %27 : vector<32x32xf32>
    %cst_15 = arith.constant 0.000000e+00 : f32
    %29 = vector.broadcast %cst_15 : f32 to vector<32x32xf32>
    %30 = arith.maximumf %28, %29 : vector<32x32xf32>
    %cst_16 = arith.constant 0.000000e+00 : f32
    %31 = vector.broadcast %cst_16 : f32 to vector<2x1x32xf32>
    %32 = vector.shape_cast %30 : vector<32x32xf32> to vector<2x16x32xf32>
    %33 = tpu.concatenate %31, %32, %31 in 1 : vector<2x1x32xf32>, vector<2x16x32xf32>, vector<2x1x32xf32> -> vector<2x18x32xf32>
    %cst_17 = arith.constant 0.000000e+00 : f32
    %34 = vector.broadcast %cst_17 : f32 to vector<32x64xf32>
    %35 = vector.extract_strided_slice %33 {offsets = [0, 0, 0], sizes = [2, 16, 32], strides = [1, 1, 1]} : vector<2x18x32xf32> to vector<2x16x32xf32>
    %36 = vector.shape_cast %35 : vector<2x16x32xf32> to vector<32x32xf32>
    %37 = arith.truncf %36 : vector<32x32xf32> to vector<32x32xbf16>
    %c0_18 = arith.constant 0 : index
    %c0_19 = arith.constant 0 : index
    %c0_20 = arith.constant 0 : index
    %38 = vector.load %arg4[%c0_18, %c0_19, %c0_20] : memref<3x32x64xbf16, #tpu.memory_space<vmem>>, vector<1x32x64xbf16>
    %39 = vector.shape_cast %38 : vector<1x32x64xbf16> to vector<32x64xbf16>
    %cst_21 = arith.constant dense<0.000000e+00> : vector<32x64xf32>
    %40 = tpu.matmul %37, %39, %cst_21 {dimension_numbers = #tpu.dot_dimension_numbers<[1], [0], [0], [1], [0, 0, 1, 1], [], []>} : vector<32x32xbf16>, vector<32x64xbf16>, vector<32x64xf32> -> vector<32x64xf32>
    %41 = arith.addf %34, %40 : vector<32x64xf32>
    %42 = vector.extract_strided_slice %33 {offsets = [0, 1, 0], sizes = [2, 16, 32], strides = [1, 1, 1]} : vector<2x18x32xf32> to vector<2x16x32xf32>
    %43 = vector.shape_cast %42 : vector<2x16x32xf32> to vector<32x32xf32>
    %44 = arith.truncf %43 : vector<32x32xf32> to vector<32x32xbf16>
    %c1_22 = arith.constant 1 : index
    %c0_23 = arith.constant 0 : index
    %c0_24 = arith.constant 0 : index
    %45 = vector.load %arg4[%c1_22, %c0_23, %c0_24] : memref<3x32x64xbf16, #tpu.memory_space<vmem>>, vector<1x32x64xbf16>
    %46 = vector.shape_cast %45 : vector<1x32x64xbf16> to vector<32x64xbf16>
    %cst_25 = arith.constant dense<0.000000e+00> : vector<32x64xf32>
    %47 = tpu.matmul %44, %46, %cst_25 {dimension_numbers = #tpu.dot_dimension_numbers<[1], [0], [0], [1], [0, 0, 1, 1], [], []>} : vector<32x32xbf16>, vector<32x64xbf16>, vector<32x64xf32> -> vector<32x64xf32>
    %48 = arith.addf %41, %47 : vector<32x64xf32>
    %49 = vector.extract_strided_slice %33 {offsets = [0, 2, 0], sizes = [2, 16, 32], strides = [1, 1, 1]} : vector<2x18x32xf32> to vector<2x16x32xf32>
    %50 = vector.shape_cast %49 : vector<2x16x32xf32> to vector<32x32xf32>
    %51 = arith.truncf %50 : vector<32x32xf32> to vector<32x32xbf16>
    %c2_26 = arith.constant 2 : index
    %c0_27 = arith.constant 0 : index
    %c0_28 = arith.constant 0 : index
    %52 = vector.load %arg4[%c2_26, %c0_27, %c0_28] : memref<3x32x64xbf16, #tpu.memory_space<vmem>>, vector<1x32x64xbf16>
    %53 = vector.shape_cast %52 : vector<1x32x64xbf16> to vector<32x64xbf16>
    %cst_29 = arith.constant dense<0.000000e+00> : vector<32x64xf32>
    %54 = tpu.matmul %51, %53, %cst_29 {dimension_numbers = #tpu.dot_dimension_numbers<[1], [0], [0], [1], [0, 0, 1, 1], [], []>} : vector<32x32xbf16>, vector<32x64xbf16>, vector<32x64xf32> -> vector<32x64xf32>
    %55 = arith.addf %48, %54 : vector<32x64xf32>
    %c0_30 = arith.constant 0 : index
    %c0_31 = arith.constant 0 : index
    %56 = vector.load %arg5[%c0_30, %c0_31] : memref<1x64xf32, #tpu.memory_space<vmem>>, vector<1x64xf32>
    %57 = vector.broadcast %56 : vector<1x64xf32> to vector<32x64xf32>
    %58 = arith.addf %55, %57 : vector<32x64xf32>
    %cst_32 = arith.constant 0.000000e+00 : f32
    %59 = vector.broadcast %cst_32 : f32 to vector<32x64xf32>
    %60 = arith.maximumf %58, %59 : vector<32x64xf32>
    %c0_33 = arith.constant 0 : index
    %c0_34 = arith.constant 0 : index
    %61 = vector.load %arg6[%c0_33, %c0_34] : memref<1x64xf32, #tpu.memory_space<vmem>>, vector<1x64xf32>
    %62 = vector.broadcast %61 : vector<1x64xf32> to vector<32x64xf32>
    %63 = arith.mulf %60, %62 : vector<32x64xf32>
    %cst_35 = arith.constant dense<0.000000e+00> : vector<32xf32>
    %64 = vector.multi_reduction <add>, %63, %cst_35 [1] : vector<32x64xf32> to vector<32xf32>
    %65 = vector.shape_cast %64 : vector<32xf32> to vector<32x1xf32>
    %66 = vector.shape_cast %65 : vector<32x1xf32> to vector<2x16xf32>
    %cst_36 = arith.constant dense<0.000000e+00> : vector<2xf32>
    %67 = vector.multi_reduction <add>, %66, %cst_36 [1] : vector<2x16xf32> to vector<2xf32>
    %68 = vector.shape_cast %67 : vector<2xf32> to vector<2x1xf32>
    %cst_37 = arith.constant 1.600000e+01 : f32
    %69 = vector.broadcast %cst_37 : f32 to vector<2x1xf32>
    %70 = arith.divf %68, %69 : vector<2x1xf32>
    %c0_38 = arith.constant 0 : index
    %71 = memref.load %arg7[%c0_38] : memref<1xf32, #tpu.memory_space<smem>>
    %72 = vector.broadcast %71 : f32 to vector<2x1xf32>
    %73 = arith.addf %70, %72 : vector<2x1xf32>
    %c0_39 = arith.constant 0 : index
    %c0_40 = arith.constant 0 : index
    %74 = vector.load %arg8[%c0_39, %c0_40] : memref<2x1xf32, #tpu.memory_space<vmem>>, vector<2x1xf32>
    tpu.vector_store %arg8[%c0_39, %c0_40], %73 {strides = array<i32>} : memref<2x1xf32, #tpu.memory_space<vmem>>, vector<2x1xf32>,
    return
  }
  func.func @transform_0(%arg0: i32) -> (i32, i32, i32) {
    %c0_i32 = arith.constant 0 : i32
    %c0_i32_0 = arith.constant 0 : i32
    %c0_i32_1 = arith.constant 0 : i32
    return %arg0, %c0_i32, %c0_i32_0 : i32, i32, i32
  }
  func.func @transform_1(%arg0: i32) -> (i32, i32, i32) {
    %c0_i32 = arith.constant 0 : i32
    %c0_i32_0 = arith.constant 0 : i32
    %c0_i32_1 = arith.constant 0 : i32
    %c0_i32_2 = arith.constant 0 : i32
    return %c0_i32, %c0_i32_0, %c0_i32_1 : i32, i32, i32
  }
  func.func @transform_2(%arg0: i32) -> (i32, i32) {
    %c0_i32 = arith.constant 0 : i32
    %c0_i32_0 = arith.constant 0 : i32
    %c0_i32_1 = arith.constant 0 : i32
    return %c0_i32, %c0_i32_0 : i32, i32
  }
  func.func @transform_3(%arg0: i32) -> (i32, i32, i32) {
    %c0_i32 = arith.constant 0 : i32
    %c0_i32_0 = arith.constant 0 : i32
    %c0_i32_1 = arith.constant 0 : i32
    %c0_i32_2 = arith.constant 0 : i32
    return %c0_i32, %c0_i32_0, %c0_i32_1 : i32, i32, i32
  }
  func.func @transform_4(%arg0: i32) -> (i32, i32) {
    %c0_i32 = arith.constant 0 : i32
    %c0_i32_0 = arith.constant 0 : i32
    %c0_i32_1 = arith.constant 0 : i32
    return %c0_i32, %c0_i32_0 : i32, i32
  }
  func.func @transform_5(%arg0: i32) -> (i32, i32) {
    %c0_i32 = arith.constant 0 : i32
    %c0_i32_0 = arith.constant 0 : i32
    %c0_i32_1 = arith.constant 0 : i32
    return %c0_i32, %c0_i32_0 : i32, i32
  }
  func.func @transform_6(%arg0: i32) -> i32 {
    %c0_i32 = arith.constant 0 : i32
    %c0_i32_0 = arith.constant 0 : i32
    return %c0_i32 : i32
  }
  func.func @transform_7(%arg0: i32) -> (i32, i32) {
    %c0_i32 = arith.constant 0 : i32
    %c0_i32_0 = arith.constant 0 : i32
    return %arg0, %c0_i32 : i32, i32
  }
}

</mosaic_0001>

<bundles_post_ra>
// kernel: tpu_custom_call.1
= control target key start
LH: loop header
LB: loop body
LE: loop exit
PB: predicated region body
PF: predicated region fallthrough
CT: control target
= control target key end

     0   :  { %13 = vsyncpa [#allocation4], 0  ;;  %s1108_s0 = inlined_call_operand.hbm [shape: f32[2,8,16], index: 0, kind: input, shape index: {}]   ;;  %s1109_s1 = inlined_call_operand.hbm [shape: bf16[3,8,32], index: 1, kind: input, shape index: {}]   ;;  %s1110_s2 = inlined_call_operand.vmem [shape: f32[1,32], index: 2, kind: input, shape index: {}]   ;;  %s1111_s3 = inlined_call_operand.hbm [shape: bf16[3,32,64], index: 3, kind: input, shape index: {}]   ;;  %s1112_s4 = inlined_call_operand.vmem [shape: f32[1,64], index: 4, kind: input, shape index: {}]   ;;  %s1113_s5 = inlined_call_operand.vmem [shape: f32[1,64], index: 5, kind: input, shape index: {}]   ;;  %s1114_s6 = inlined_call_operand.<no memory space> [shape: f32[1], index: 6, kind: input, shape index: {}]   ;;  %s1115_s7 = inlined_call_operand.vmem [shape: f32[2,1], index: 7, kind: output, shape index: {}]  }
   0x1   :  { %14 = vsyncpa [#allocation6], 0  ;;  %s958_s24 = smov [#allocation5]   ;;  %s888_s28 = scalar_lea.hbm %s1109_s1, 192 }
   0x2   :  { %s32_s25 = sshll.u32 %s958_s24, 4  ;;  %p889_p0 = scmp.ne.s32.totalorder %s1109_s1, %s888_s28  ;;  %s33_s25 = int_to_ptr.vmem [resolvable:$true] %s32_s25 }
   0x3   :  { %p892_p1 = scmp.lt.u32.totalorder %s888_s28, %s1109_s1 }
   0x5   :  { %p894_p2 = pnand %p892_p1, %p889_p0 }
   0x7   :  { %897 = shalt.err (!%p894_p2)
}
   0x8   :  { %s898_s10 = scalar_lea.vmem %s33_s25, 192  ;;  %p903_p4 = scmp.lt.s32.totalorder %s33_s25, %s33_s25 }
   0x9   :  { %p899_p3 = scmp.ne.s32.totalorder %s33_s25, %s898_s10  ;;  %p904_p5 = scmp.lt.s32.totalorder %s898_s10, %s898_s10 }
   0xb   :  { %p905_p6 = por %p904_p5, %p903_p4 }
   0xd   :  { %p906_p7 = pnand %p905_p6, %p899_p3 }
   0xf   :  { %909 = shalt.err (!%p906_p7)
}
  0x10   :  { %s959_s11 = smov 64   ;;  %s960_s12 = smov 4  }
  0x11   :  { %38 = dma.hbm_to_vmem [thread:$0]  %s1109_s1, 192, %s33_s25, [#allocation6], %s959_s11, %s959_s11, %s960_s12  }
  0x12   :  { %s961_s15 = smov [#allocation3]   ;;  %s910_s19 = scalar_lea.hbm %s1108_s0, 256 }
  0x13   :  { %s20_s16 = sshll.u32 %s961_s15, 4  ;;  %p911_p8 = scmp.ne.s32.totalorder %s1108_s0, %s910_s19  ;;  %s21_s16 = int_to_ptr.vmem [resolvable:$true] %s20_s16 }
  0x14   :  { %p914_p9 = scmp.lt.u32.totalorder %s910_s19, %s1108_s0 }
  0x16   :  { %p916_p10 = pnand %p914_p9, %p911_p8 }
  0x18   :  { %919 = shalt.err (!%p916_p10)
}
  0x19   :  { %s920_s24 = scalar_lea.vmem %s21_s16, 256  ;;  %p925_p12 = scmp.lt.s32.totalorder %s21_s16, %s21_s16 }
  0x1a   :  { %p921_p11 = scmp.ne.s32.totalorder %s21_s16, %s920_s24  ;;  %p926_p13 = scmp.lt.s32.totalorder %s920_s24, %s920_s24 }
  0x1c   :  { %p927_p0 = por %p926_p13, %p925_p12 }
  0x1e   :  { %p928_p1 = pnand %p927_p0, %p921_p11 }
  0x20   :  { %931 = shalt.err (!%p928_p1)
}
  0x21   :  { %s962_s1 = smov 128   ;;  %s963_s25 = smov 8  }
  0x22   :  { %26 = dma.hbm_to_vmem [thread:$0]  %s1108_s0, 256, %s21_s16, [#allocation4], %s962_s1, %s962_s1, %s963_s25  }
  0x23   :  { %s964_s28 = smov [#allocation7]   ;;  %s932_s9 = scalar_lea.hbm %s1111_s3, 768 }
  0x24   :  { %s46_s29 = sshll.u32 %s964_s28, 4  ;;  %p933_p2 = scmp.ne.s32.totalorder %s1111_s3, %s932_s9  ;;  %s47_s29 = int_to_ptr.vmem [resolvable:$true] %s46_s29 }
  0x25   :  { %p936_p3 = scmp.lt.u32.totalorder %s932_s9, %s1111_s3 }
  0x27   :  { %p938_p4 = pnand %p936_p3, %p933_p2 }
  0x29   :  { %941 = shalt.err (!%p938_p4)
}
  0x2a   :  { %s942_s17 = scalar_lea.vmem %s47_s29, 768  ;;  %p947_p6 = scmp.lt.s32.totalorder %s47_s29, %s47_s29 }
  0x2b   :  { %p943_p5 = scmp.ne.s32.totalorder %s47_s29, %s942_s17  ;;  %p948_p7 = scmp.lt.s32.totalorder %s942_s17, %s942_s17 }
  0x2d   :  { %p949_p8 = por %p948_p7, %p947_p6 }
  0x2f   :  { %p950_p9 = pnand %p949_p8, %p943_p5 }
  0x31   :  { %953 = shalt.err (!%p950_p9)
}
  0x32   :  { %52 = dma.hbm_to_vmem [thread:$0]  %s1111_s3, 768, %s47_s29, [#allocation6], %s959_s11, %s959_s11, %s960_s12  }
  0x33   :  { %954 = dma.done.wait [#allocation4], 256  }
  0x34   :  { %955 = vsyncadd [#allocation4], 4294967040 }
  0x35   :  { %956 = dma.done.wait [#allocation6], 960  }
  0x36   :  { %957 = vsyncadd [#allocation6], 4294966336  ;;  %v69_v0 = vld [vmem:[#allocation3] sm:$0xff]  ;;  %v70_v1 = vld [vmem:[#allocation3 + $0x8] sm:$0xff]  ;;  %vm189_vm0 = vcmask 1043456   ;;  %vm139_vm1 = vcmask 1040384  }
  0x37   :  { %v870_v2 = vpack.i.bf16 %v70_v1, %v69_v0  ;;  %v181_v3 = vld [vmem:[#allocation5 + $0x4] sm:$0xf]  ;;  %v158_v5 = vld [vmem:[#allocation5] sm:$0xf]  ;;  %vm163_vm2 = vcmask 1046528   ;;  %vm182_vm3 = vcmask 64512  }
  0x38   :  { %859 = vmatprep.subr.msk.bf16.mxu0 %vm189_vm0, %v181_v3  ;;  %v191_v4 = vsel %vm189_vm0, %v181_v3, 0  ;;  %v249_v34 = vsel %vm189_vm0, %v158_v5, 0  ;;  %v318_v36 = vld [vmem:[#allocation5 + $0x8] sm:$0xf]  ;;  %vm300_vm4 = vcmask 1045504   ;;  %v882_v51 = vld [vmem:[#allocation7 + $0x10] sm:$0xff]  }
  0x39   :  { %871 = vxpose.xlu0.b32.start.end [1/1] (short) (narrow) %v870_v2, 16  ;;  %802 = vmatpush3.bf16.msra.mxu0 %v191_v4  ;;  %v326_v43 = vsel %vm189_vm0, %v318_v36, 0  ;;  %v883_v52 = vld [vmem:[#allocation7 + $0x18] sm:$0xff]   ;;  %v884_v53 = vld [vmem:[#allocation7] sm:$0xff]   ;;  %vm459_vm5 = vcmask 261120   ;;  %vm700_vm6 = vcmask 523264  }
  0x3a   :  { %860 = vmatprep.subr.msk.bf16.mxu0 %vm189_vm0, %v158_v5  ;;  %819 = vmatprep.subr.bf16.mxu1 %v882_v51  ;;  %v765_v54 = vld [vmem:[%s1110_s2] ss:$0 sm:$0xff]  ;;  %vm728_vm7 = vcmask 130112   ;;  %vm739_vm8 = vcmask 1041409   ;;  %vm742_vm9 = vcmask 123904   ;;  %vm751_vm10 = vcmask 1024  }
  0x3b   :  { %820 = vmatpush3.bf16.msra.mxu1 %v882_v51 }
  0x3c   :  { %821 = vmatprep.subr.bf16.mxu1 %v883_v52 }
  0x3f   :  { %822 = vmatpush3.bf16.msra.mxu1 %v883_v52 }
  0x40   :  { %827 = vmatprep.subr.bf16.mxu1 %v884_v53 }
  0xb9   :  { %v872_v6 = vpop.trf.xlu0 }
  0xba   :  { %v876_v7 = vunpack.i.h.bf16 %v872_v6  ;;  %v873_v8 = vunpack.i.l.bf16 %v872_v6 }
  0xbc   :  { %v143_v9 = vrot.slane %v876_v7, 7  ;;  %v140_v11 = vrot.slane %v873_v8, 7 }
  0xbd   :  { %v877_v10 = vpop.trf.xlu0 }
  0xbe   :  { %v881_v12 = vunpack.i.h.bf16 %v877_v10  ;;  %v878_v14 = vunpack.i.l.bf16 %v877_v10  ;;  %v153_v15 = vsel %vm139_vm1, 0.0, %v143_v9  ;;  %v152_v16 = vsel %vm139_vm1, 0.0, %v140_v11 }
  0xbf   :  { %v169_v22 = vrot.slane %v153_v15, 1  ;;  %v164_v25 = vrot.slane %v152_v16, 1  ;;  %v301_v39 = vrot.slane %v152_v16, 2  ;;  %v306_v47 = vrot.slane %v153_v15, 2 }
  0xc0   :  { %v144_v13 = vrot.slane %v881_v12, 7  ;;  %v141_v18 = vrot.slane %v878_v14, 7 }
  0xc2   :  { %v155_v17 = vsel %vm139_vm1, %v144_v13, 0.0  ;;  %v145_v19 = vsel %vm139_vm1, %v143_v9, %v144_v13  ;;  %v142_v23 = vsel %vm139_vm1, %v140_v11, %v141_v18  ;;  %v154_v24 = vsel %vm139_vm1, %v141_v18, 0.0 }
  0xc3   :  { %v172_v20 = vrot.slane %v155_v17, 1  ;;  %v170_v21 = vrot.slane %v145_v19, 1  ;;  %v165_v26 = vrot.slane %v142_v23, 1  ;;  %v167_v27 = vrot.slane %v154_v24, 1 }
  0xc4   :  { %v156_v35 = vpack.c.bf16 %v142_v23, %v152_v16  ;;  %v302_v37 = vrot.slane %v142_v23, 2  ;;  %v304_v38 = vrot.slane %v154_v24, 2  ;;  %v157_v42 = vpack.c.bf16 %v145_v19, %v153_v15 }
  0xc5   :  { %v171_v28 = vsel %vm163_vm2, %v169_v22, %v170_v21  ;;  %v173_v29 = vsel %vm163_vm2, %v170_v21, %v172_v20  ;;  %v166_v30 = vsel %vm163_vm2, %v164_v25, %v165_v26  ;;  %v168_v31 = vsel %vm163_vm2, %v165_v26, %v167_v27 }
  0xc6   :  { %v179_v32 = vpack.c.bf16 %v173_v29, %v171_v28  ;;  %v178_v33 = vpack.c.bf16 %v168_v31, %v166_v30  ;;  %v303_v40 = vsel %vm300_vm4, %v301_v39, %v302_v37  ;;  %v305_v41 = vsel %vm300_vm4, %v302_v37, %v304_v38  ;;  %v885_v39 = vld [vmem:[#allocation7 + $0x8] sm:$0xff]  }
  0xc7   :  { %v315_v44 = vpack.c.bf16 %v305_v41, %v303_v40  ;;  %v309_v45 = vrot.slane %v155_v17, 2  ;;  %v307_v46 = vrot.slane %v145_v19, 2  ;;  %v886_v40 = vld [vmem:[#allocation7 + $0x20] sm:$0xff]   ;;  %v887_v41 = vld [vmem:[#allocation7 + $0x28] sm:$0xff]  }
  0xc8   :  { %803 = vmatprep.mubr.msk.bf16.mxu0 %vm182_vm3, %v178_v33 }
  0xc9   :  { %804 = vmatmul.mubr.msk.bf16.vlgmr.msra.gmra.mrb[0].mxu0 %vm182_vm3, %v179_v32  ;;  %v308_v48 = vsel %vm300_vm4, %v306_v47, %v307_v46  ;;  %v310_v49 = vsel %vm300_vm4, %v307_v46, %v309_v45 }
  0xca   :  { %808 = vmatpush3.bf16.msra.mxu0 %v249_v34  ;;  %809 = vmatprep.mubr.msk.bf16.mxu0 %vm182_vm3, %v156_v35  ;;  %v316_v50 = vpack.c.bf16 %v310_v49, %v308_v48  ;;  %v779_v48 = vld [vmem:[%s1113_s5] ss:$0 sm:$0xff] }
  0xcb   :  { %861 = vmatprep.subr.msk.bf16.mxu0 %vm189_vm0, %v318_v36 }
  0xd5   :  { %810 = vmatmul.mubr.msk.bf16.vlgmr.msra.gmra.mrb[0].mxu0 %vm182_vm3, %v157_v42  ;;  %v778_v42 = vld [vmem:[%s1112_s4] ss:$0 sm:$0xff] }
  0xd6   :  { %814 = vmatpush3.bf16.msra.mxu0 %v326_v43  ;;  %815 = vmatprep.mubr.msk.bf16.mxu0 %vm182_vm3, %v315_v44 }
  0xe1   :  { %816 = vmatmul.mubr.msk.bf16.vlgmr.msra.gmra.mrb[0].mxu0 %vm182_vm3, %v316_v50 }
 0x1b4   :  { %v817_v55 = vpop.f32.mrb[0].mxu0 }
 0x1b5   :  { %v390_v56 = vadd.f32 %v817_v55, %v765_v54  ;;  %v362_v57 = vpop.f32.mrb[1].mxu0 }
 0x1b6   :  { %v388_v58 = vadd.f32 %v765_v54, %v362_v57  ;;  %v818_v59 = vpop.f32.mrb[2].mxu0 }
 0x1b7   :  { %v394_v60 = vmax.f32 %v390_v56, 0.0  ;;  %v391_v61 = vadd.f32 %v818_v59, %v765_v54  ;;  %v365_v62 = vpop.f32.mrb[3].mxu0 }
 0x1b8   :  { %v392_v63 = vmax.f32 %v388_v58, 0.0  ;;  %v389_v0 = vadd.f32 %v765_v54, %v365_v62 }
 0x1b9   :  { %v403_v1 = vrot.slane %v394_v60, 7  ;;  %v395_v2 = vmax.f32 %v391_v61, 0.0 }
 0x1ba   :  { %v400_v3 = vrot.slane %v392_v63, 7  ;;  %v393_v4 = vmax.f32 %v389_v0, 0.0  ;;  %v717_v0 = vlaneseq }
 0x1bb   :  { %v413_v5 = vsel %vm139_vm1, 0.0, %v403_v1  ;;  %v404_v6 = vrot.slane %v395_v2, 7 }
 0x1bc   :  { %v431_v7 = vrot.slane %v413_v5, 1  ;;  %v412_v8 = vsel %vm139_vm1, 0.0, %v400_v3  ;;  %v401_v9 = vrot.slane %v393_v4, 7  ;;  %v587_v10 = vrot.slane %v413_v5, 2 }
 0x1bd   :  { %v426_v11 = vrot.slane %v412_v8, 1  ;;  %v405_v12 = vsel %vm139_vm1, %v403_v1, %v404_v6  ;;  %v415_v13 = vsel %vm139_vm1, %v404_v6, 0.0  ;;  %v582_v18 = vrot.slane %v412_v8, 2 }
 0x1be   :  { %v417_v14 = vpack.c.bf16 %v405_v12, %v413_v5  ;;  %v432_v15 = vrot.slane %v405_v12, 1  ;;  %v434_v16 = vrot.slane %v415_v13, 1  ;;  %v588_v17 = vrot.slane %v405_v12, 2 }
 0x1bf   :  { %v590_v19 = vrot.slane %v415_v13, 2  ;;  %v402_v20 = vsel %vm139_vm1, %v400_v3, %v401_v9  ;;  %v414_v21 = vsel %vm139_vm1, %v401_v9, 0.0  ;;  %v718_v1 = vand.u32 127, %v717_v0 }
 0x1c0   :  { %v589_v22 = vsel %vm300_vm4, %v587_v10, %v588_v17  ;;  %v429_v23 = vrot.slane %v414_v21, 1  ;;  %v583_v24 = vrot.slane %v402_v20, 2  ;;  %v585_v25 = vrot.slane %v414_v21, 2 }
 0x1c1   :  { %v591_v26 = vsel %vm300_vm4, %v588_v17, %v590_v19  ;;  %v427_v27 = vrot.slane %v402_v20, 1  ;;  %v433_v28 = vsel %vm163_vm2, %v431_v7, %v432_v15  ;;  %v435_v29 = vsel %vm163_vm2, %v432_v15, %v434_v16 }
 0x1c2   :  { %v597_v30 = vpack.c.bf16 %v591_v26, %v589_v22  ;;  %v441_v31 = vpack.c.bf16 %v435_v29, %v433_v28  ;;  %v416_v32 = vpack.c.bf16 %v402_v20, %v412_v8  ;;  %v584_v33 = vsel %vm300_vm4, %v582_v18, %v583_v24 }
 0x1c3   :  { %v428_v34 = vsel %vm163_vm2, %v426_v11, %v427_v27  ;;  %v430_v35 = vsel %vm163_vm2, %v427_v27, %v429_v23  ;;  %v586_v36 = vsel %vm300_vm4, %v583_v24, %v585_v25  ;;  %v723_v2 = vadd.s32 4294967288, %v718_v1 }
 0x1c4   :  { %v440_v37 = vpack.c.bf16 %v430_v35, %v428_v34  ;;  %v596_v38 = vpack.c.bf16 %v586_v36, %v584_v33  ;;  %v720_v4 = vshrl.u32 %v717_v0, 7  ;;  %v749_v18 = vstv %s1114_s6 }
 0x1c6   :  { %823 = vmatprep.mubr.msk.bf16.mxu1 %vm459_vm5, %v440_v37  ;;  %v726_v5 = vsub.s32 %v723_v2, %v720_v4  ;;  %v721_v7 = vsub.s32 %v718_v1, %v720_v4 }
 0x1c7   :  { %824 = vmatmul.mubr.msk.bf16.vlgmr.msra.gmra.mrb[0].mxu1 %vm459_vm5, %v441_v31 }
 0x1c8   :  { %828 = vmatpush3.bf16.msra.mxu1 %v884_v53  ;;  %831 = vmatprep.mubr.msk.bf16.mxu1 %vm459_vm5, %v416_v32 }
 0x1c9   :  { %829 = vmatprep.subr.bf16.mxu1 %v885_v39 }
 0x1cc   :  { %830 = vmatpush3.bf16.msra.mxu1 %v885_v39 }
 0x1cd   :  { %835 = vmatprep.subr.bf16.mxu1 %v886_v40 }
 0x1d3   :  { %832 = vmatmul.mubr.msk.bf16.vlgmr.msra.gmra.mrb[0].mxu1 %vm459_vm5, %v417_v14 }
 0x1d4   :  { %836 = vmatpush3.bf16.msra.mxu1 %v886_v40  ;;  %839 = vmatprep.mubr.msk.bf16.mxu1 %vm459_vm5, %v596_v38 }
 0x1d5   :  { %837 = vmatprep.subr.bf16.mxu1 %v887_v41 }
 0x1d8   :  { %838 = vmatpush3.bf16.msra.mxu1 %v887_v41 }
 0x1df   :  { %840 = vmatmul.mubr.msk.bf16.vlgmr.msra.gmra.mrb[0].mxu1 %vm459_vm5, %v597_v30 }
 0x2b2   :  { %v841_v43 = vpop.f32.mrb[0].mxu1 }
 0x2b3   :  { %v683_v44 = vadd.f32 %v841_v43, %v778_v42  ;;  %v655_v45 = vpop.f32.mrb[1].mxu1 }
 0x2b4   :  { %v681_v46 = vadd.f32 %v778_v42, %v655_v45  ;;  %v842_v47 = vpop.f32.mrb[2].mxu1 }
 0x2b5   :  { %v687_v49 = vmax.f32 %v683_v44, 0.0  ;;  %v684_v50 = vadd.f32 %v842_v47, %v778_v42  ;;  %v658_v51 = vpop.f32.mrb[3].mxu1 }
 0x2b6   :  { %v685_v52 = vmax.f32 %v681_v46, 0.0  ;;  %v682_v53 = vadd.f32 %v778_v42, %v658_v51 }
 0x2b7   :  { %v698_v54 = vmul.f32 %v779_v48, %v687_v49  ;;  %v688_v57 = vmax.f32 %v684_v50, 0.0 }
 0x2b8   :  { %v686_v55 = vmax.f32 %v682_v53, 0.0  ;;  %v696_v56 = vmul.f32 %v779_v48, %v685_v52 }
 0x2b9   :  { %v707_v58 = vsel %vm700_vm6, %v698_v54, 0.0  ;;  %v699_v62 = vmul.f32 %v779_v48, %v688_v57 }
 0x2ba   :  { %708 = vadd.xlane.f32.xlu1 %v707_v58  ;;  %v701_v59 = vsel %vm700_vm6, %v696_v56, 0.0  ;;  %v697_v60 = vmul.f32 %v779_v48, %v686_v55 }
 0x2bb   :  { %702 = vadd.xlane.f32.xlu0 %v701_v59  ;;  %v710_v63 = vsel %vm700_vm6, %v699_v62, 0.0 }
 0x2bc   :  { %v704_v61 = vsel %vm700_vm6, %v697_v60, 0.0 }
 0x2be   :  { %705 = vadd.xlane.f32.xlu1 %v704_v61 }
 0x2c2   :  { %711 = vadd.xlane.f32.xlu1 %v710_v63 }
 0x347   :  { %v709_v3 = vpop.xlane.xlu1 %708 }
 0x348   :  { %v703_v8 = vpop.xlane.xlu0 %702  ;;  %v733_v11 = vrot.slane %v709_v3, %v721_v7 }
 0x349   :  { %v722_v12 = vrot.slane %v703_v8, %v721_v7 }
 0x34b   :  { %v706_v6 = vpop.xlane.xlu1 %705 }
 0x34c   :  { %v727_v9 = vrot.slane %v706_v6, %v726_v5 }
 0x34e   :  { %v729_v14 = vsel %vm728_vm7, %v727_v9, %v722_v12 }
 0x34f   :  { %v712_v10 = vpop.xlane.xlu1 %711 }
 0x350   :  { %v737_v13 = vrot.slane %v712_v10, %v726_v5 }
 0x352   :  { %v738_v15 = vsel %vm728_vm7, %v737_v13, %v733_v11 }
 0x353   :  { %v740_v16 = vsel %vm739_vm8, %v738_v15, %v729_v14 }
 0x354   :  { %v743_v17 = vsel %vm742_vm9, %v740_v16, 0.0 }
 0x355   :  { %744 = vadd.xlane.f32.xlu1 %v743_v17 }
 0x3e2   :  { %v745_v19 = vpop.xlane.xlu1 %744 }
 0x3e3   :  { %v747_v20 = vmul.f32 0.0625, %v745_v19 }
 0x3e5   :  { %v750_v21 = vadd.f32 %v749_v18, %v747_v20 }
 0x3e7   :  { %752 = vst.msk [vmem:[%s1115_s7] sm:$0x3] %vm751_vm10, %v750_v21 }
 0x3e8   :  { %757 = vsyncpa [#allocation4], 1 }
 0x3e9   :  { %758 = vsyncpa [#allocation6], 1 }

</bundles_post_ra>
